<compile_context>
chip_gen: v6e
topology: v6e:2x2x1
jax: 0.10.0
libtpu: 0.0.40
codegen_flags: <defaults>
</compile_context>

<pallas_src>
import jax
import jax.numpy as jnp
from jax import lax
from jax.experimental import pallas as pl
from jax.experimental.pallas import tpu as pltpu


def _round_up(x, m):
    return (x + m - 1) // m * m


def _choose_batch_block(n):
    """Images per grid step.

    Keep >= 2 grid steps when possible (both v7x TensorCores busy under
    dimension_semantics=("parallel",)) and <= 8 images per step (amortizes the
    ~0.35us per-step pipeline overhead on single-TC v5e/v6e).
    """
    for b in (8, 4, 2, 1):
        if n % b == 0 and n // b >= 2:
            return b
    return n


# ---------------------------------------------------------------------------
# Fused Pallas kernel: conv1+ReLU -> conv2+ReLU -> global average pool
# ---------------------------------------------------------------------------
def _make_feature_kernel(H, W):
    HW = H * W

    def kernel(x_ref, w1_ref, b1_ref, w2_ref, b2_ref, o_ref):
        # x_ref : (B_blk, Cin_pad, HW)  channels on sublanes, H*W on lanes
        # w1_ref: (C1, 9*Cin_pad)       conv1 weights, K tap-major (ky*3+kx, cin)
        # b1_ref: (C1, 1)
        # w2_ref: (C2, 9*C1)            conv2 weights, K tap-major
        # b2_ref: (C2, 1)
        # o_ref : (1, C2, B_blk)        pooled features for this batch chunk
        B_blk = x_ref.shape[0]
        inv_hw = 1.0 / float(HW)

        # SAME-padding boundary masks, one per 3x3 tap.  Hoisted once: shared
        # by both convs and every image in the chunk.  No integer division is
        # used (row tests compare the flat index, column tests use a bitwise
        # AND when W is a power of two).
        lane = lax.broadcasted_iota(jnp.int32, (1, HW), 1)
        if W & (W - 1) == 0:
            col = jnp.bitwise_and(lane, W - 1)
        else:
            col = lane % W  # TODO(synk): generic-W fallback (vector int mod)

        shifts, masks = [], []
        for k in range(9):
            dy, dx = k // 3 - 1, k % 3 - 1
            shifts.append(dy * W + dx)
            conds = []
            if dy < 0:
                conds.append(lane >= (-dy) * W)          # row >= -dy
            if dy > 0:
                conds.append(lane < (H - dy) * W)        # row <  H - dy
            if dx < 0:
                conds.append(col >= -dx)
            if dx > 0:
                conds.append(col < W - dx)
            if conds:
                m = conds[0]
                for c in conds[1:]:
                    m = jnp.logical_and(m, c)
                masks.append(m.astype(jnp.float32))
            else:
                masks.append(None)                       # center tap

        def im2col(a):
            # a: (C, HW) -> (9*C, HW).  Row index k*C + c matches the weight
            # reshape done in the wrapper.  C is a multiple of 8, so the
            # sublane concatenation is tile-aligned (pure vreg placement);
            # the lane shift rides the XLU slot, the mask multiply the VPU.
            taps = []
            for k in range(9):
                d = shifts[k]
                t = a if d == 0 else pltpu.roll(a, (-d) % HW, 1)
                if masks[k] is not None:
                    t = t * masks[k]
                taps.append(t)
            return jnp.concatenate(taps, axis=0)

        cols = []
        for b in range(B_blk):                           # static, unrolled
            xb = x_ref[b]                                # (Cin_pad, HW)
            # conv1 (3x3, SAME) + ReLU : ONE MXU GEMM, K = 9*Cin_pad
            y1 = jnp.maximum(
                jnp.dot(w1_ref[...], im2col(xb),
                        preferred_element_type=jnp.float32) + b1_ref[...],
                0.0)                                     # (C1, HW)
            # conv2 (3x3, SAME) + ReLU : ONE MXU GEMM, K = 9*C1
            y2 = jnp.maximum(
                jnp.dot(w2_ref[...], im2col(y1),
                        preferred_element_type=jnp.float32) + b2_ref[...],
                0.0)                                     # (C2, HW)
            # fused global average pool (cross-lane reduce on the XLU)
            cols.append(jnp.sum(y2, axis=1, keepdims=True) * inv_hw)  # (C2,1)

        o_blk = cols[0] if B_blk == 1 else jnp.concatenate(cols, axis=1)
        o_ref[0] = o_blk.astype(o_ref.dtype)             # (C2, B_blk)

    return kernel


# ---------------------------------------------------------------------------
# Wrapper: layout conversion + single pallas_call
# ---------------------------------------------------------------------------
@jax.jit
def tembedding_forward(params, x_nchw):
    """Feature extractor forward: conv+relu -> conv+relu -> global avg pool."""
    N, Cin, H, W = x_nchw.shape
    HW = H * W
    C1 = params["w1"].shape[0]
    C2 = params["w2"].shape[0]
    assert C1 % 8 == 0 and C2 % 8 == 0, "intermediate channels assumed 8-aligned"

    # Pure reshape: no NHWC transpose, no spatial halo pad.  The only padding
    # is rounding the input-channel dim up to one 8-sublane tile so the
    # in-kernel im2col concatenation stays tile-aligned; the matching weight
    # columns are zero, so numerics are exact.
    cin_pad = _round_up(Cin, 8)
    x_flat = x_nchw.reshape(N, Cin, HW)
    if cin_pad != Cin:
        x_flat = jnp.pad(x_flat, ((0, 0), (0, cin_pad - Cin), (0, 0)))

    # Conv weights (Cout, Cin, 3, 3) -> (Cout, 9*Cin_pad), K tap-major.
    w1 = jnp.transpose(params["w1"], (0, 2, 3, 1))        # (C1, 3, 3, Cin)
    if cin_pad != Cin:
        w1 = jnp.pad(w1, ((0, 0), (0, 0), (0, 0), (0, cin_pad - Cin)))
    w1r = w1.reshape(C1, 9 * cin_pad)
    w2r = jnp.transpose(params["w2"], (0, 2, 3, 1)).reshape(C2, 9 * C1)
    b1r = params["b1"].reshape(C1, 1)
    b2r = params["b2"].reshape(C2, 1)

    B_blk = _choose_batch_block(N)
    grid_n = N // B_blk

    pooled = pl.pallas_call(
        _make_feature_kernel(H, W),
        out_shape=jax.ShapeDtypeStruct((grid_n, C2, B_blk), jnp.float32),
        grid_spec=pltpu.PrefetchScalarGridSpec(
            num_scalar_prefetch=0,
            grid=(grid_n,),
            in_specs=[
                pl.BlockSpec((B_blk, cin_pad, HW), lambda n: (n, 0, 0)),
                pl.BlockSpec((C1, 9 * cin_pad), lambda n: (0, 0)),
                pl.BlockSpec((C1, 1), lambda n: (0, 0)),
                pl.BlockSpec((C2, 9 * C1), lambda n: (0, 0)),
                pl.BlockSpec((C2, 1), lambda n: (0, 0)),
            ],
            out_specs=pl.BlockSpec((1, C2, B_blk), lambda n: (n, 0, 0)),
        ),
        compiler_params=pltpu.CompilerParams(
            dimension_semantics=("parallel",),
        ),
    )(x_flat, w1r, b1r, w2r, b2r)

    # (grid_n, C2, B_blk) -> (N, C2, 1, 1) to match AdaptiveAvgPool2d(1).
    return jnp.transpose(pooled, (0, 2, 1)).reshape(N, C2, 1, 1)


# ---------------------------------------------------------------------------
# Deterministic parameter init (synthetic backbone)
# ---------------------------------------------------------------------------
def init_params(key, cin=4, c1=8, c2=16):
    k1, k2, k3, k4 = jax.random.split(key, 4)
    return {
        "w1": 0.1 * jax.random.normal(k1, (c1, cin, 3, 3), jnp.float32),
        "b1": 0.1 * jax.random.normal(k2, (c1,), jnp.float32),
        "w2": 0.1 * jax.random.normal(k3, (c2, c1, 3, 3), jnp.float32),
        "b2": 0.1 * jax.random.normal(k4, (c2,), jnp.float32),
    }


# ---------------------------------------------------------------------------
# Reference (pure JAX / XLA) for correctness check
# ---------------------------------------------------------------------------
def reference_forward(params, x_nchw):
    def conv(x, w, b):
        y = jax.lax.conv_general_dilated(
            x, w, window_strides=(1, 1), padding="SAME",
            dimension_numbers=("NCHW", "OIHW", "NCHW"))
        return jax.nn.relu(y + b[None, :, None, None])
    y = conv(x_nchw, params["w1"], params["b1"])
    y = conv(y, params["w2"], params["b2"])
    return jnp.mean(y, axis=(2, 3), keepdims=True)


if __name__ == "__main__":
    key = jax.random.PRNGKey(0)
    kp, kx = jax.random.split(key)
    params = init_params(kp)

    # Small, module-consistent input: batch=2, channels=4, spatial=16x16 (NCHW)
    x = jax.random.normal(kx, (2, 4, 16, 16), jnp.float32)

    out = jax.block_until_ready(tembedding_forward(params, x))
    ref = jax.block_until_ready(reference_forward(params, x))

    assert out.shape == (2, 16, 1, 1), out.shape
    assert jnp.allclose(out, ref, atol=1e-4, rtol=1e-4), "mismatch vs reference"

    print("KERNEL_OK")
</pallas_src>

<mosaic_0001>
module attributes {stable_mosaic.version = 11 : i64} {
  func.func @kernel(%arg0: i32, %arg1: memref<1x8x256xf32, #tpu.memory_space<vmem>>, %arg2: memref<8x72xf32, #tpu.memory_space<vmem>>, %arg3: memref<8x1xf32, #tpu.memory_space<vmem>>, %arg4: memref<16x72xf32, #tpu.memory_space<vmem>>, %arg5: memref<16x1xf32, #tpu.memory_space<vmem>>, %arg6: memref<1x16x1xf32, #tpu.memory_space<vmem>>) attributes {dimension_semantics = [#tpu.dimension_semantics<parallel>], iteration_bounds = array<i64: 2>, scalar_prefetch = 0 : i64, scratch_operands = 0 : i64, tpu.core_type = #tpu.core_type<tc>, window_params = [{transform_indices = @transform_0, window_bounds = array<i64: 1, 8, 256>}, {pipeline_mode = #tpu.pipeline_mode<synchronous>, transform_indices = @transform_1, window_bounds = array<i64: 8, 72>}, {pipeline_mode = #tpu.pipeline_mode<synchronous>, transform_indices = @transform_2, window_bounds = array<i64: 8, 1>}, {pipeline_mode = #tpu.pipeline_mode<synchronous>, transform_indices = @transform_3, window_bounds = array<i64: 16, 72>}, {pipeline_mode = #tpu.pipeline_mode<synchronous>, transform_indices = @transform_4, window_bounds = array<i64: 16, 1>}, {transform_indices = @transform_5, window_bounds = array<i64: 1, 16, 1>}]} {
    %0 = tpu.iota {dimensions = array<i32: 1>} : vector<1x256xi32>
    %c15_i32 = arith.constant 15 : i32
    %1 = vector.broadcast %c15_i32 : i32 to vector<1x256xi32>
    %2 = arith.andi %0, %1 : vector<1x256xi32>
    %c16_i32 = arith.constant 16 : i32
    %3 = vector.broadcast %c16_i32 : i32 to vector<1x256xi32>
    %4 = arith.cmpi sge, %0, %3 : vector<1x256xi32>
    %c1_i32 = arith.constant 1 : i32
    %5 = vector.broadcast %c1_i32 : i32 to vector<1x256xi32>
    %6 = arith.cmpi sge, %2, %5 : vector<1x256xi32>
    %7 = arith.andi %4, %6 : vector<1x256xi1>
    %8 = arith.extui %7 : vector<1x256xi1> to vector<1x256xi32>
    %9 = arith.sitofp %8 : vector<1x256xi32> to vector<1x256xf32>
    %c16_i32_0 = arith.constant 16 : i32
    %10 = vector.broadcast %c16_i32_0 : i32 to vector<1x256xi32>
    %11 = arith.cmpi sge, %0, %10 : vector<1x256xi32>
    %12 = arith.extui %11 : vector<1x256xi1> to vector<1x256xi32>
    %13 = arith.sitofp %12 : vector<1x256xi32> to vector<1x256xf32>
    %c16_i32_1 = arith.constant 16 : i32
    %14 = vector.broadcast %c16_i32_1 : i32 to vector<1x256xi32>
    %15 = arith.cmpi sge, %0, %14 : vector<1x256xi32>
    %c15_i32_2 = arith.constant 15 : i32
    %16 = vector.broadcast %c15_i32_2 : i32 to vector<1x256xi32>
    %17 = arith.cmpi slt, %2, %16 : vector<1x256xi32>
    %18 = arith.andi %15, %17 : vector<1x256xi1>
    %19 = arith.extui %18 : vector<1x256xi1> to vector<1x256xi32>
    %20 = arith.sitofp %19 : vector<1x256xi32> to vector<1x256xf32>
    %c1_i32_3 = arith.constant 1 : i32
    %21 = vector.broadcast %c1_i32_3 : i32 to vector<1x256xi32>
    %22 = arith.cmpi sge, %2, %21 : vector<1x256xi32>
    %23 = arith.extui %22 : vector<1x256xi1> to vector<1x256xi32>
    %24 = arith.sitofp %23 : vector<1x256xi32> to vector<1x256xf32>
    %c15_i32_4 = arith.constant 15 : i32
    %25 = vector.broadcast %c15_i32_4 : i32 to vector<1x256xi32>
    %26 = arith.cmpi slt, %2, %25 : vector<1x256xi32>
    %27 = arith.extui %26 : vector<1x256xi1> to vector<1x256xi32>
    %28 = arith.sitofp %27 : vector<1x256xi32> to vector<1x256xf32>
    %c240_i32 = arith.constant 240 : i32
    %29 = vector.broadcast %c240_i32 : i32 to vector<1x256xi32>
    %30 = arith.cmpi slt, %0, %29 : vector<1x256xi32>
    %c1_i32_5 = arith.constant 1 : i32
    %31 = vector.broadcast %c1_i32_5 : i32 to vector<1x256xi32>
    %32 = arith.cmpi sge, %2, %31 : vector<1x256xi32>
    %33 = arith.andi %30, %32 : vector<1x256xi1>
    %34 = arith.extui %33 : vector<1x256xi1> to vector<1x256xi32>
    %35 = arith.sitofp %34 : vector<1x256xi32> to vector<1x256xf32>
    %c240_i32_6 = arith.constant 240 : i32
    %36 = vector.broadcast %c240_i32_6 : i32 to vector<1x256xi32>
    %37 = arith.cmpi slt, %0, %36 : vector<1x256xi32>
    %38 = arith.extui %37 : vector<1x256xi1> to vector<1x256xi32>
    %39 = arith.sitofp %38 : vector<1x256xi32> to vector<1x256xf32>
    %c240_i32_7 = arith.constant 240 : i32
    %40 = vector.broadcast %c240_i32_7 : i32 to vector<1x256xi32>
    %41 = arith.cmpi slt, %0, %40 : vector<1x256xi32>
    %c15_i32_8 = arith.constant 15 : i32
    %42 = vector.broadcast %c15_i32_8 : i32 to vector<1x256xi32>
    %43 = arith.cmpi slt, %2, %42 : vector<1x256xi32>
    %44 = arith.andi %41, %43 : vector<1x256xi1>
    %45 = arith.extui %44 : vector<1x256xi1> to vector<1x256xi32>
    %46 = arith.sitofp %45 : vector<1x256xi32> to vector<1x256xf32>
    %c0 = arith.constant 0 : index
    %c0_9 = arith.constant 0 : index
    %c0_10 = arith.constant 0 : index
    %47 = vector.load %arg1[%c0, %c0_9, %c0_10] : memref<1x8x256xf32, #tpu.memory_space<vmem>>, vector<1x8x256xf32>
    %48 = vector.shape_cast %47 : vector<1x8x256xf32> to vector<8x256xf32>
    %c0_11 = arith.constant 0 : index
    %c0_12 = arith.constant 0 : index
    %49 = vector.load %arg2[%c0_11, %c0_12] : memref<8x72xf32, #tpu.memory_space<vmem>>, vector<8x72xf32>
    %c17_i32 = arith.constant 17 : i32
    %50 = tpu.dynamic_rotate %48 by %c17_i32 dim 1 : vector<8x256xf32>, i32 -> vector<8x256xf32>
    %51 = vector.broadcast %9 : vector<1x256xf32> to vector<8x256xf32>
    %52 = arith.mulf %50, %51 : vector<8x256xf32>
    %c16_i32_13 = arith.constant 16 : i32
    %53 = tpu.dynamic_rotate %48 by %c16_i32_13 dim 1 : vector<8x256xf32>, i32 -> vector<8x256xf32>
    %54 = vector.broadcast %13 : vector<1x256xf32> to vector<8x256xf32>
    %55 = arith.mulf %53, %54 : vector<8x256xf32>
    %c15_i32_14 = arith.constant 15 : i32
    %56 = tpu.dynamic_rotate %48 by %c15_i32_14 dim 1 : vector<8x256xf32>, i32 -> vector<8x256xf32>
    %57 = vector.broadcast %20 : vector<1x256xf32> to vector<8x256xf32>
    %58 = arith.mulf %56, %57 : vector<8x256xf32>
    %c1_i32_15 = arith.constant 1 : i32
    %59 = tpu.dynamic_rotate %48 by %c1_i32_15 dim 1 : vector<8x256xf32>, i32 -> vector<8x256xf32>
    %60 = vector.broadcast %24 : vector<1x256xf32> to vector<8x256xf32>
    %61 = arith.mulf %59, %60 : vector<8x256xf32>
    %c255_i32 = arith.constant 255 : i32
    %62 = tpu.dynamic_rotate %48 by %c255_i32 dim 1 : vector<8x256xf32>, i32 -> vector<8x256xf32>
    %63 = vector.broadcast %28 : vector<1x256xf32> to vector<8x256xf32>
    %64 = arith.mulf %62, %63 : vector<8x256xf32>
    %c241_i32 = arith.constant 241 : i32
    %65 = tpu.dynamic_rotate %48 by %c241_i32 dim 1 : vector<8x256xf32>, i32 -> vector<8x256xf32>
    %66 = vector.broadcast %35 : vector<1x256xf32> to vector<8x256xf32>
    %67 = arith.mulf %65, %66 : vector<8x256xf32>
    %c240_i32_16 = arith.constant 240 : i32
    %68 = tpu.dynamic_rotate %48 by %c240_i32_16 dim 1 : vector<8x256xf32>, i32 -> vector<8x256xf32>
    %69 = vector.broadcast %39 : vector<1x256xf32> to vector<8x256xf32>
    %70 = arith.mulf %68, %69 : vector<8x256xf32>
    %c239_i32 = arith.constant 239 : i32
    %71 = tpu.dynamic_rotate %48 by %c239_i32 dim 1 : vector<8x256xf32>, i32 -> vector<8x256xf32>
    %72 = vector.broadcast %46 : vector<1x256xf32> to vector<8x256xf32>
    %73 = arith.mulf %71, %72 : vector<8x256xf32>
    %74 = tpu.concatenate %52, %55, %58, %61, %48, %64, %67, %70, %73 in 0 : vector<8x256xf32>, vector<8x256xf32>, vector<8x256xf32>, vector<8x256xf32>, vector<8x256xf32>, vector<8x256xf32>, vector<8x256xf32>, vector<8x256xf32>, vector<8x256xf32> -> vector<72x256xf32>
    %cst = arith.constant dense<0.000000e+00> : vector<8x256xf32>
    %75 = tpu.matmul %49, %74, %cst {dimension_numbers = #tpu.dot_dimension_numbers<[1], [0], [0], [1], [0, 0, 1, 1], [], []>} : vector<8x72xf32>, vector<72x256xf32>, vector<8x256xf32> -> vector<8x256xf32>
    %c0_17 = arith.constant 0 : index
    %c0_18 = arith.constant 0 : index
    %76 = vector.load %arg3[%c0_17, %c0_18] : memref<8x1xf32, #tpu.memory_space<vmem>>, vector<8x1xf32>
    %77 = vector.broadcast %76 : vector<8x1xf32> to vector<8x256xf32>
    %78 = arith.addf %75, %77 : vector<8x256xf32>
    %cst_19 = arith.constant 0.000000e+00 : f32
    %79 = vector.broadcast %cst_19 : f32 to vector<8x256xf32>
    %80 = arith.maximumf %78, %79 : vector<8x256xf32>
    %c0_20 = arith.constant 0 : index
    %c0_21 = arith.constant 0 : index
    %81 = vector.load %arg4[%c0_20, %c0_21] : memref<16x72xf32, #tpu.memory_space<vmem>>, vector<16x72xf32>
    %c17_i32_22 = arith.constant 17 : i32
    %82 = tpu.dynamic_rotate %80 by %c17_i32_22 dim 1 : vector<8x256xf32>, i32 -> vector<8x256xf32>
    %83 = vector.broadcast %9 : vector<1x256xf32> to vector<8x256xf32>
    %84 = arith.mulf %82, %83 : vector<8x256xf32>
    %c16_i32_23 = arith.constant 16 : i32
    %85 = tpu.dynamic_rotate %80 by %c16_i32_23 dim 1 : vector<8x256xf32>, i32 -> vector<8x256xf32>
    %86 = vector.broadcast %13 : vector<1x256xf32> to vector<8x256xf32>
    %87 = arith.mulf %85, %86 : vector<8x256xf32>
    %c15_i32_24 = arith.constant 15 : i32
    %88 = tpu.dynamic_rotate %80 by %c15_i32_24 dim 1 : vector<8x256xf32>, i32 -> vector<8x256xf32>
    %89 = vector.broadcast %20 : vector<1x256xf32> to vector<8x256xf32>
    %90 = arith.mulf %88, %89 : vector<8x256xf32>
    %c1_i32_25 = arith.constant 1 : i32
    %91 = tpu.dynamic_rotate %80 by %c1_i32_25 dim 1 : vector<8x256xf32>, i32 -> vector<8x256xf32>
    %92 = vector.broadcast %24 : vector<1x256xf32> to vector<8x256xf32>
    %93 = arith.mulf %91, %92 : vector<8x256xf32>
    %c255_i32_26 = arith.constant 255 : i32
    %94 = tpu.dynamic_rotate %80 by %c255_i32_26 dim 1 : vector<8x256xf32>, i32 -> vector<8x256xf32>
    %95 = vector.broadcast %28 : vector<1x256xf32> to vector<8x256xf32>
    %96 = arith.mulf %94, %95 : vector<8x256xf32>
    %c241_i32_27 = arith.constant 241 : i32
    %97 = tpu.dynamic_rotate %80 by %c241_i32_27 dim 1 : vector<8x256xf32>, i32 -> vector<8x256xf32>
    %98 = vector.broadcast %35 : vector<1x256xf32> to vector<8x256xf32>
    %99 = arith.mulf %97, %98 : vector<8x256xf32>
    %c240_i32_28 = arith.constant 240 : i32
    %100 = tpu.dynamic_rotate %80 by %c240_i32_28 dim 1 : vector<8x256xf32>, i32 -> vector<8x256xf32>
    %101 = vector.broadcast %39 : vector<1x256xf32> to vector<8x256xf32>
    %102 = arith.mulf %100, %101 : vector<8x256xf32>
    %c239_i32_29 = arith.constant 239 : i32
    %103 = tpu.dynamic_rotate %80 by %c239_i32_29 dim 1 : vector<8x256xf32>, i32 -> vector<8x256xf32>
    %104 = vector.broadcast %46 : vector<1x256xf32> to vector<8x256xf32>
    %105 = arith.mulf %103, %104 : vector<8x256xf32>
    %106 = tpu.concatenate %84, %87, %90, %93, %80, %96, %99, %102, %105 in 0 : vector<8x256xf32>, vector<8x256xf32>, vector<8x256xf32>, vector<8x256xf32>, vector<8x256xf32>, vector<8x256xf32>, vector<8x256xf32>, vector<8x256xf32>, vector<8x256xf32> -> vector<72x256xf32>
    %cst_30 = arith.constant dense<0.000000e+00> : vector<16x256xf32>
    %107 = tpu.matmul %81, %106, %cst_30 {dimension_numbers = #tpu.dot_dimension_numbers<[1], [0], [0], [1], [0, 0, 1, 1], [], []>} : vector<16x72xf32>, vector<72x256xf32>, vector<16x256xf32> -> vector<16x256xf32>
    %c0_31 = arith.constant 0 : index
    %c0_32 = arith.constant 0 : index
    %108 = vector.load %arg5[%c0_31, %c0_32] : memref<16x1xf32, #tpu.memory_space<vmem>>, vector<16x1xf32>
    %109 = vector.broadcast %108 : vector<16x1xf32> to vector<16x256xf32>
    %110 = arith.addf %107, %109 : vector<16x256xf32>
    %cst_33 = arith.constant 0.000000e+00 : f32
    %111 = vector.broadcast %cst_33 : f32 to vector<16x256xf32>
    %112 = arith.maximumf %110, %111 : vector<16x256xf32>
    %cst_34 = arith.constant dense<0.000000e+00> : vector<16xf32>
    %113 = vector.multi_reduction <add>, %112, %cst_34 [1] : vector<16x256xf32> to vector<16xf32>
    %114 = vector.shape_cast %113 : vector<16xf32> to vector<16x1xf32>
    %cst_35 = arith.constant 3.906250e-03 : f32
    %115 = vector.broadcast %cst_35 : f32 to vector<16x1xf32>
    %116 = arith.mulf %114, %115 : vector<16x1xf32>
    %c0_36 = arith.constant 0 : index
    %c0_37 = arith.constant 0 : index
    %c0_38 = arith.constant 0 : index
    %117 = vector.load %arg6[%c0_36, %c0_37, %c0_38] : memref<1x16x1xf32, #tpu.memory_space<vmem>>, vector<1x16x1xf32>
    %118 = vector.shape_cast %117 : vector<1x16x1xf32> to vector<16x1xf32>
    %119 = vector.shape_cast %116 : vector<16x1xf32> to vector<1x16x1xf32>
    tpu.vector_store %arg6[%c0_36, %c0_37, %c0_38], %119 {strides = array<i32>} : memref<1x16x1xf32, #tpu.memory_space<vmem>>, vector<1x16x1xf32>,
    return
  }
  func.func @transform_0(%arg0: i32) -> (i32, i32, i32) {
    %c0_i32 = arith.constant 0 : i32
    %c0_i32_0 = arith.constant 0 : i32
    %c0_i32_1 = arith.constant 0 : i32
    return %arg0, %c0_i32, %c0_i32_0 : i32, i32, i32
  }
  func.func @transform_1(%arg0: i32) -> (i32, i32) {
    %c0_i32 = arith.constant 0 : i32
    %c0_i32_0 = arith.constant 0 : i32
    %c0_i32_1 = arith.constant 0 : i32
    return %c0_i32, %c0_i32_0 : i32, i32
  }
  func.func @transform_2(%arg0: i32) -> (i32, i32) {
    %c0_i32 = arith.constant 0 : i32
    %c0_i32_0 = arith.constant 0 : i32
    %c0_i32_1 = arith.constant 0 : i32
    return %c0_i32, %c0_i32_0 : i32, i32
  }
  func.func @transform_3(%arg0: i32) -> (i32, i32) {
    %c0_i32 = arith.constant 0 : i32
    %c0_i32_0 = arith.constant 0 : i32
    %c0_i32_1 = arith.constant 0 : i32
    return %c0_i32, %c0_i32_0 : i32, i32
  }
  func.func @transform_4(%arg0: i32) -> (i32, i32) {
    %c0_i32 = arith.constant 0 : i32
    %c0_i32_0 = arith.constant 0 : i32
    %c0_i32_1 = arith.constant 0 : i32
    return %c0_i32, %c0_i32_0 : i32, i32
  }
  func.func @transform_5(%arg0: i32) -> (i32, i32, i32) {
    %c0_i32 = arith.constant 0 : i32
    %c0_i32_0 = arith.constant 0 : i32
    %c0_i32_1 = arith.constant 0 : i32
    return %arg0, %c0_i32, %c0_i32_0 : i32, i32, i32
  }
}

</mosaic_0001>

<bundles_post_ra>
// kernel: tembedding_forward.1
= control target key start
LH: loop header
LB: loop body
LE: loop exit
PB: predicated region body
PF: predicated region fallthrough
CT: control target
= control target key end

     0   :  { %s765_s18 = smov 0   ;;  %s1040_s0 = inlined_call_operand.vmem [shape: f32[2,8,256], index: 0, kind: input, shape index: {}]   ;;  %s1041_s1 = inlined_call_operand.vmem [shape: f32[8,72], index: 1, kind: input, shape index: {}]   ;;  %s1042_s2 = inlined_call_operand.vmem [shape: f32[8,1], index: 2, kind: input, shape index: {}]   ;;  %s1043_s3 = inlined_call_operand.vmem [shape: f32[16,72], index: 3, kind: input, shape index: {}]   ;;  %s1044_s4 = inlined_call_operand.vmem [shape: f32[16,1], index: 4, kind: input, shape index: {}]   ;;  %s1045_s5 = inlined_call_operand.vmem [shape: f32[2,16,1], index: 5, kind: output, shape index: {}]  }
   0x1 LB: > { %s667_s19 = sadd.s32 4294967295, %s723_s18   ;;  %p671_p0 = scmp.ge.s32.totalorder %s723_s18, 1  ;;  %s723_s18 = sphi %s765_s18, %s15_s18  }
   0x2   : > { %p187_p1 = scmp.lt.s32.totalorder %s723_s18, 3 }
   0x4   : > { %p188_p2 = pnand %p671_p0, %p187_p1 }
   0x5   : > { %p215_p3 = scmp.lt.s32.totalorder (!%p188_p2), %s667_s19, 1  ;;  %s726_s24 = smov (!%p188_p2), 112  }
   0x6   : > { %191 = sbr.rel (%p188_p2) target bundleno = 858 (0x35a), region = 40  ;;  %s727_s25 = smov (!%p188_p2), 111  }
   0x7   : > { %s728_s26 = smov (!%p188_p2), 113   ;;  %s729_s27 = smov (!%p188_p2), 127  }
   0x8   : > { %s730_s28 = smov (!%p188_p2), 1   ;;  %s731_s29 = smov (!%p188_p2), 15  }
   0x9   : > { %s733_s30 = smov (!%p188_p2), 16   ;;  %s734_s6 = smov (!%p188_p2), 17  }
   0xb   : > { %v725_v0 = vmov 0.0   ;;  %s1055_s19 = smov (!%p215_p3, %s667_s19), 1  ;;  %v732_v3 = vmov 0   ;;  %v353_v4 = vld [vmem:[%s1042_s2] sm:$0xff]  ;;  %v225_v5 = vlaneseq  ;;  %v503_v19 = vld [vmem:[%s1044_s4 + $0x8] sm:$0xff] }
   0xc   : > { %427 = vmatprep.mubr.f32.mxu0 %v725_v0  ;;  %584 = vmatprep.mubr.f32.mxu1 %v725_v0  ;;  %s695_s20 = sshll.u32 %s1055_s19, 4 }
   0xd   : > { %s219_s23 = scalar_lea.vmem %s1040_s0, %s695_s20  ;;  %715 = vset.pattern.permute.xlu0 %v732_v3  ;;  %716 = vset.pattern.permute.xlu1 %v732_v3  ;;  %v822_v6 = vand.u32 127, %v225_v5 }
   0xe   : > { %v783_v1 = vld [vmem:[%s219_s23] sm:$0xff]  ;;  %v789_v2 = vld [vmem:[%s219_s23 + $0x8] sm:$0xff] }
   0xf   : > { %335 = vrot.lane.b32.xlu1 %v783_v1, %s726_s24  ;;  %344 = vrot.lane.b32.xlu0 %v783_v1, %s727_s25  ;;  %v227_v7 = vadd.s32 128, %v822_v6  ;;  %v228_v9 = vand.u32 15, %v822_v6  ;;  %vm339_vm5 = vcmp.lt.s32.totalorder %v822_v6, 112  ;;  %vm348_vm6 = vcmp.lt.s32.totalorder %v822_v6, 111 }
  0x10   : > { %vm330_vm9 = vcmp.lt.s32.totalorder %v822_v6, 113  ;;  %vm321_vm10 = vcmp.lt.s32.totalorder %v822_v6, 127  ;;  %vm230_vm11 = vcmp.ge.s32.totalorder %v822_v6, 16  ;;  %vm312_vm12 = vcmp.lt.s32.totalorder %v822_v6, 1 }
  0x11   : > { %v229_v8 = vand.u32 15, %v227_v7  ;;  %vm261_vm0 = vcmp.lt.s32.totalorder %v227_v7, 240  ;;  %vm832_vm3 = vcmp.lt.s32.totalorder %v228_v9, 15  ;;  %vm850_vm7 = vcmp.ge.s32.totalorder %v228_v9, 1 }
  0x12   : > { %v848_v16 = vsel %vm832_vm3, 1.0, %v725_v0  ;;  %v857_v20 = vsel %vm261_vm0, 1.0, %v725_v0  ;;  %v871_v26 = vsel %vm850_vm7, 1.0, %v725_v0  ;;  %vm246_vm13 = vmand %vm230_vm11, %vm832_vm3  ;;  %vm303_vm14 = vcmp.lt.s32.totalorder %v822_v6, 15 }
  0x13   : > { %337 = vrot.lane.b32.xlu1 %v789_v2, %s726_s24  ;;  %346 = vrot.lane.b32.xlu0 %v789_v2, %s727_s25  ;;  %vm826_vm1 = vcmp.lt.s32.totalorder %v229_v8, 15  ;;  %vm836_vm4 = vcmp.ge.s32.totalorder %v229_v8, 1  ;;  %v918_v50 = vsel %vm246_vm13, 1.0, %v725_v0  ;;  %vm294_vm15 = vcmp.lt.s32.totalorder %v822_v6, 16  ;;  %v280_v8 = vld [vmem:[%s1041_s1] sm:$0xff] }
  0x14   : > { %vm273_vm2 = vmand %vm261_vm0, %vm826_vm1  ;;  %v889_v36 = vsel %vm826_vm1, 1.0, %v725_v0  ;;  %v902_v43 = vsel %vm836_vm4, 1.0, %v725_v0  ;;  %v930_v57 = vsel %vm230_vm11, 1.0, %v725_v0  ;;  %vm285_vm1 = vcmp.lt.s32.totalorder %v822_v6, 17 }
  0x15   : > { %v843_v15 = vsel %vm273_vm2, 1.0, %v725_v0  ;;  %vm263_vm8 = vmand %vm261_vm0, %vm836_vm4  ;;  %vm359_vm2 = vcmask 588800   ;;  %vm609_vm3 = vcmask 7168  }
  0x16   : > { %v874_v27 = vsel %vm263_vm8, 1.0, %v725_v0  ;;  %vm234_vm0 = vmand %vm230_vm11, %vm850_vm7 }
  0x17   : > { %328 = vrot.lane.b32.xlu1 %v789_v2, %s728_s26  ;;  %326 = vrot.lane.b32.xlu0 %v783_v1, %s728_s26  ;;  %v943_v63 = vsel %vm234_vm0, 1.0, %v725_v0 }
  0x1b   : > { %319 = vrot.lane.b32.xlu1 %v789_v2, %s729_s27  ;;  %317 = vrot.lane.b32.xlu0 %v783_v1, %s729_s27 }
  0x1f   : > { %310 = vrot.lane.b32.xlu1 %v789_v2, %s730_s28  ;;  %308 = vrot.lane.b32.xlu0 %v783_v1, %s730_s28 }
  0x23   : > { %301 = vrot.lane.b32.xlu1 %v789_v2, %s731_s29  ;;  %299 = vrot.lane.b32.xlu0 %v783_v1, %s731_s29 }
  0x27   : > { %292 = vrot.lane.b32.xlu1 %v789_v2, %s733_s30  ;;  %290 = vrot.lane.b32.xlu0 %v783_v1, %s733_s30 }
  0x2b   : > { %283 = vrot.lane.b32.xlu1 %v789_v2, %s734_s6  ;;  %281 = vrot.lane.b32.xlu0 %v783_v1, %s734_s6 }
  0x2f   : > { %356 = vperm.xlu0 %715, %v353_v4  }
  0x81   : > { %v336_v11 = vpop.permute.xlu1 %335  ;;  %v345_v12 = vpop.permute.xlu0 %344 }
  0x85   : > { %v338_v17 = vpop.permute.xlu1 %337  ;;  %v347_v18 = vpop.permute.xlu0 %346 }
  0x86   : > { %v341_v21 = vsel %vm339_vm5, %v338_v17, %v336_v11  ;;  %v349_v22 = vsel %vm348_vm6, %v345_v12, %v347_v18  ;;  %v350_v23 = vsel %vm348_vm6, %v347_v18, %v345_v12  ;;  %v340_v35 = vsel %vm339_vm5, %v336_v11, %v338_v17  ;;  %v502_v18 = vld [vmem:[%s1044_s4] sm:$0xff] }
  0x87   : > { %v352_v24 = vmul.f32 %v843_v15, %v350_v23  ;;  %v351_v25 = vmul.f32 %v848_v16, %v349_v22  ;;  %v343_v28 = vmul.f32 %v857_v20, %v341_v21 }
  0x89   : > { %v329_v29 = vpop.permute.xlu1 %328  ;;  %377 = vmatprep.subr.mxu0 %v352_v24  ;;  %v327_v30 = vpop.permute.xlu0 %326 }
  0x8a   : > { %v331_v31 = vsel %vm330_vm9, %v327_v30, %v329_v29  ;;  %v332_v32 = vsel %vm330_vm9, %v329_v29, %v327_v30  ;;  %378 = vmatpush1.msra.mxu0 %v351_v25 }
  0x8b   : > { %v333_v33 = vmul.f32 %v871_v26, %v331_v31  ;;  %v334_v34 = vmul.f32 %v874_v27, %v332_v32  ;;  %379 = vmatprep.subr.mxu0 %v343_v28 }
  0x8c   : > { %380 = vmatpush1.msra.mxu0 %v340_v35 }
  0x8d   : > { %v320_v37 = vpop.permute.xlu1 %319  ;;  %381 = vmatprep.subr.mxu0 %v334_v34  ;;  %v318_v38 = vpop.permute.xlu0 %317 }
  0x8e   : > { %v322_v39 = vsel %vm321_vm10, %v318_v38, %v320_v37  ;;  %v323_v40 = vsel %vm321_vm10, %v320_v37, %v318_v38  ;;  %382 = vmatpush1.msra.mxu0 %v333_v33 }
  0x8f   : > { %v324_v41 = vmul.f32 %v848_v16, %v322_v39  ;;  %v325_v42 = vmul.f32 %v889_v36, %v323_v40 }
  0x91   : > { %v311_v44 = vpop.permute.xlu1 %310  ;;  %383 = vmatprep.subr.mxu0 %v325_v42  ;;  %v309_v45 = vpop.permute.xlu0 %308 }
  0x92   : > { %v313_v46 = vsel %vm312_vm12, %v309_v45, %v311_v44  ;;  %v314_v47 = vsel %vm312_vm12, %v311_v44, %v309_v45  ;;  %384 = vmatpush1.msra.mxu0 %v324_v41 }
  0x93   : > { %v315_v48 = vmul.f32 %v871_v26, %v314_v47  ;;  %v316_v49 = vmul.f32 %v902_v43, %v313_v46  ;;  %385 = vmatprep.subr.mxu0 %v789_v2 }
  0x94   : > { %386 = vmatpush1.msra.mxu0 %v783_v1 }
  0x95   : > { %v302_v51 = vpop.permute.xlu1 %301  ;;  %387 = vmatprep.subr.mxu0 %v316_v49  ;;  %v300_v52 = vpop.permute.xlu0 %299 }
  0x96   : > { %v304_v53 = vsel %vm303_vm14, %v300_v52, %v302_v51  ;;  %v305_v54 = vsel %vm303_vm14, %v302_v51, %v300_v52  ;;  %388 = vmatpush1.msra.mxu0 %v315_v48 }
  0x97   : > { %v306_v55 = vmul.f32 %v918_v50, %v305_v54  ;;  %v307_v56 = vmul.f32 %v889_v36, %v304_v53 }
  0x99   : > { %v293_v58 = vpop.permute.xlu1 %292  ;;  %389 = vmatprep.subr.mxu0 %v307_v56  ;;  %v291_v59 = vpop.permute.xlu0 %290 }
  0x9a   : > { %v296_v60 = vsel %vm294_vm15, %v293_v58, %v291_v59  ;;  %390 = vmatpush1.msra.mxu0 %v306_v55  ;;  %v295_v61 = vsel %vm294_vm15, %v291_v59, %v293_v58 }
  0x9b   : > { %v297_v62 = vmul.f32 %v930_v57, %v296_v60  ;;  %391 = vmatprep.subr.mxu0 %v295_v61 }
  0x9d   : > { %v284_v1 = vpop.permute.xlu1 %283  ;;  %392 = vmatpush1.msra.mxu0 %v297_v62  ;;  %v282_v2 = vpop.permute.xlu0 %281 }
  0x9e   : > { %v286_v3 = vsel %vm285_vm1, %v282_v2, %v284_v1  ;;  %v287_v4 = vsel %vm285_vm1, %v284_v1, %v282_v2 }
  0x9f   : > { %v288_v5 = vmul.f32 %v943_v63, %v287_v4  ;;  %v289_v7 = vmul.f32 %v902_v43, %v286_v3  ;;  %v436_v4 = vld [vmem:[%s1043_s3] sm:$0xff] }
  0xa1   : > { %393 = vmatprep.subr.mxu0 %v289_v7 }
  0xa2   : > { %394 = vmatpush1.msra.mxu0 %v288_v5 }
  0xa3   : > { %690 = vmatmul.mubr.msk.f32.vlgmr.msra.gmra.mxu0 %vm359_vm2, %v280_v8 }
  0xaa   : > { %v357_v9 = vpop.permute.xlu0 %356 }
 0x163   : > { %v429_v10 = vpop.f32.mrf.mxu0 }
 0x164   : > { %v430_v11 = vadd.f32 %v429_v10, %v357_v9 }
 0x165   : > { %v431_v12 = vpop.f32.mrf.mxu0 }
 0x166   : > { %v434_v13 = vmax.f32 %v430_v11, 0.0  ;;  %v432_v14 = vadd.f32 %v431_v12, %v357_v9 }
 0x168   : > { %486 = vrot.lane.b32.xlu0 %v434_v13, %s726_s24  ;;  %494 = vrot.lane.b32.xlu1 %v434_v13, %s727_s25  ;;  %v435_v17 = vmax.f32 %v432_v14, 0.0 }
 0x16c   : > { %478 = vrot.lane.b32.xlu0 %v434_v13, %s728_s26  ;;  %496 = vrot.lane.b32.xlu1 %v435_v17, %s727_s25 }
 0x170   : > { %470 = vrot.lane.b32.xlu0 %v434_v13, %s729_s27  ;;  %488 = vrot.lane.b32.xlu1 %v435_v17, %s726_s24  ;;  %s224_s24 = scalar_lea.vmem %s1045_s5, %s695_s20 }
 0x174   : > { %462 = vrot.lane.b32.xlu0 %v434_v13, %s730_s28  ;;  %480 = vrot.lane.b32.xlu1 %v435_v17, %s728_s26 }
 0x178   : > { %454 = vrot.lane.b32.xlu0 %v434_v13, %s731_s29  ;;  %472 = vrot.lane.b32.xlu1 %v435_v17, %s729_s27 }
 0x17c   : > { %446 = vrot.lane.b32.xlu0 %v434_v13, %s733_s30  ;;  %464 = vrot.lane.b32.xlu1 %v435_v17, %s730_s28 }
 0x180   : > { %438 = vrot.lane.b32.xlu0 %v434_v13, %s734_s6  ;;  %456 = vrot.lane.b32.xlu1 %v435_v17, %s731_s29 }
 0x184   : > { %506 = vperm.xlu0 %715, %v502_v18   ;;  %448 = vrot.lane.b32.xlu1 %v435_v17, %s733_s30 }
 0x188   : > { %440 = vrot.lane.b32.xlu1 %v435_v17, %s734_s6 }
 0x18c   : > { %511 = vperm.xlu1 %716, %v503_v19  }
 0x1da   : > { %v487_v21 = vpop.permute.xlu0 %486  ;;  %v495_v22 = vpop.permute.xlu1 %494 }
 0x1de   : > { %v479_v23 = vpop.permute.xlu0 %478  ;;  %v497_v24 = vpop.permute.xlu1 %496 }
 0x1df   : > { %v498_v25 = vsel %vm348_vm6, %v495_v22, %v497_v24  ;;  %v499_v28 = vsel %vm348_vm6, %v497_v24, %v495_v22 }
 0x1e0   : > { %v501_v29 = vmul.f32 %v843_v15, %v499_v28  ;;  %v500_v30 = vmul.f32 %v848_v16, %v498_v25 }
 0x1e2   : > { %v471_v31 = vpop.permute.xlu0 %470  ;;  %534 = vmatprep.subr.mxu1 %v501_v29  ;;  %v489_v32 = vpop.permute.xlu1 %488 }
 0x1e3   : > { %v491_v33 = vsel %vm339_vm5, %v489_v32, %v487_v21  ;;  %535 = vmatpush1.msra.mxu1 %v500_v30  ;;  %v490_v37 = vsel %vm339_vm5, %v487_v21, %v489_v32 }
 0x1e4   : > { %v493_v34 = vmul.f32 %v857_v20, %v491_v33 }
 0x1e6   : > { %536 = vmatprep.subr.mxu1 %v493_v34  ;;  %v481_v35 = vpop.permute.xlu1 %480  ;;  %v463_v39 = vpop.permute.xlu0 %462 }
 0x1e7   : > { %v482_v38 = vsel %vm330_vm9, %v479_v23, %v481_v35  ;;  %v483_v15 = vsel %vm330_vm9, %v481_v35, %v479_v23  ;;  %537 = vmatpush1.msra.mxu1 %v490_v37 }
 0x1e8   : > { %v484_v40 = vmul.f32 %v871_v26, %v482_v38  ;;  %v485_v41 = vmul.f32 %v874_v27, %v483_v15 }
 0x1ea   : > { %538 = vmatprep.subr.mxu1 %v485_v41  ;;  %v473_v42 = vpop.permute.xlu1 %472  ;;  %v455_v47 = vpop.permute.xlu0 %454 }
 0x1eb   : > { %v474_v20 = vsel %vm321_vm10, %v471_v31, %v473_v42  ;;  %v475_v44 = vsel %vm321_vm10, %v473_v42, %v471_v31  ;;  %539 = vmatpush1.msra.mxu1 %v484_v40 }
 0x1ec   : > { %v476_v45 = vmul.f32 %v848_v16, %v474_v20  ;;  %v477_v46 = vmul.f32 %v889_v36, %v475_v44 }
 0x1ee   : > { %540 = vmatprep.subr.mxu1 %v477_v46  ;;  %v465_v48 = vpop.permute.xlu1 %464  ;;  %v447_v55 = vpop.permute.xlu0 %446 }
 0x1ef   : > { %v466_v49 = vsel %vm312_vm12, %v463_v39, %v465_v48  ;;  %v467_v27 = vsel %vm312_vm12, %v465_v48, %v463_v39  ;;  %541 = vmatpush1.msra.mxu1 %v476_v45 }
 0x1f0   : > { %v468_v51 = vmul.f32 %v871_v26, %v467_v27  ;;  %v469_v52 = vmul.f32 %v902_v43, %v466_v49  ;;  %542 = vmatprep.subr.mxu1 %v435_v17 }
 0x1f1   : > { %543 = vmatpush1.msra.mxu1 %v434_v13 }
 0x1f2   : > { %544 = vmatprep.subr.mxu1 %v469_v52  ;;  %v457_v16 = vpop.permute.xlu1 %456  ;;  %v439_v62 = vpop.permute.xlu0 %438 }
 0x1f3   : > { %v458_v53 = vsel %vm303_vm14, %v455_v47, %v457_v16  ;;  %v459_v54 = vsel %vm303_vm14, %v457_v16, %v455_v47  ;;  %545 = vmatpush1.msra.mxu1 %v468_v51 }
 0x1f4   : > { %v460_v56 = vmul.f32 %v918_v50, %v459_v54  ;;  %v461_v58 = vmul.f32 %v889_v36, %v458_v53 }
 0x1f6   : > { %546 = vmatprep.subr.mxu1 %v461_v58  ;;  %v449_v26 = vpop.permute.xlu1 %448 }
 0x1f7   : > { %v451_v59 = vsel %vm294_vm15, %v449_v26, %v447_v55  ;;  %547 = vmatpush1.msra.mxu1 %v460_v56  ;;  %v450_v60 = vsel %vm294_vm15, %v447_v55, %v449_v26 }
 0x1f8   : > { %v452_v61 = vmul.f32 %v930_v57, %v451_v59  ;;  %548 = vmatprep.subr.mxu1 %v450_v60  ;;  %v437_v57 = vld [vmem:[%s1043_s3 + $0x8] sm:$0xff] }
 0x1fa   : > { %549 = vmatpush1.msra.mxu1 %v452_v61  ;;  %v441_v1 = vpop.permute.xlu1 %440 }
 0x1fb   : > { %v442_v50 = vsel %vm285_vm1, %v439_v62, %v441_v1  ;;  %v443_v36 = vsel %vm285_vm1, %v441_v1, %v439_v62 }
 0x1fc   : > { %v444_v2 = vmul.f32 %v943_v63, %v443_v36  ;;  %v445_v3 = vmul.f32 %v902_v43, %v442_v50 }
 0x1fe   : > { %550 = vmatprep.subr.mxu1 %v445_v3 }
 0x1ff   : > { %551 = vmatpush1.msra.mxu1 %v444_v2  ;;  %v507_v6 = vpop.permute.xlu0 %506 }
 0x200   : > { %691 = vmatmul.mubr.msk.f32.vlgmr.msra.gmra.mxu1 %vm359_vm2, %v436_v4 }
 0x201   : > { %590 = vmatprep.mubr.f32.mxu1 %v725_v0 }
 0x204   : > { %692 = vmatmul.mubr.msk.f32.gmra.mxu1 %vm359_vm2, %v437_v57 }
 0x207   : > { %v512_v7 = vpop.permute.xlu1 %511 }
 0x2c0   : > { %v586_v63 = vpop.f32.mrf.mxu1 }
 0x2c1   : > { %v587_v5 = vadd.f32 %v586_v63, %v507_v6 }
 0x2c2   : > { %v588_v43 = vpop.f32.mrf.mxu1 }
 0x2c3   : > { %v589_v8 = vadd.f32 %v588_v43, %v507_v6  ;;  %v597_v10 = vmax.f32 %v587_v5, 0.0 }
 0x2c4   : > { %v592_v9 = vpop.f32.mrf.mxu1 }
 0x2c5   : > { %v598_v11 = vmax.f32 %v589_v8, 0.0  ;;  %v593_v12 = vadd.f32 %v592_v9, %v512_v7 }
 0x2c6   : > { %v594_v13 = vpop.f32.mrf.mxu1 }
 0x2c7   : > { %v595_v14 = vadd.f32 %v594_v13, %v512_v7  ;;  %v601_v0 = vadd.f32 %v598_v11, %v597_v10  ;;  %v599_v17 = vmax.f32 %v593_v12, 0.0 }
 0x2c9   : > { %v600_v18 = vmax.f32 %v595_v14, 0.0  ;;  %602 = vadd.xlane.f32.xlu0 %v601_v0 }
 0x2cb   : > { %v604_v19 = vadd.f32 %v600_v18, %v599_v17 }
 0x2cd   : > { %605 = vadd.xlane.f32.xlu1 %v604_v19 }
 0x352   : > { %v603_v21 = vpop.xlane.xlu0 %602 }
 0x353   : > { %v607_v22 = vmul.f32 0.00390625, %v603_v21 }
 0x355   : > { %610 = vst.msk [vmem:[%s224_s24] sm:$0xff] %vm609_vm3, %v607_v22 }
 0x356   : > { %v606_v23 = vpop.xlane.xlu1 %605 }
 0x357   : > { %v608_v24 = vmul.f32 0.00390625, %v606_v23 }
 0x359   : > { %611 = vst.msk [vmem:[%s224_s24 + $0x8] sm:$0xff] %vm609_vm3, %v608_v24 }
 0x35a PF: > { %s15_s18 = sadd.s32 1, %s723_s18  }
 0x35b   : > { %p12_p4 = scmp.ge.s32.totalorder %s15_s18, 4  }
 0x35d   :  { %14 = sbr.rel (!%p12_p4) target bundleno = 1 (0x1), region = 70 }

</bundles_post_ra>
